<compile_context>
chip_gen: v5e
topology: v5e:2x2
jax: 0.10.0
libtpu: 0.0.40
codegen_flags: <defaults>
</compile_context>

<pallas_src>
import functools

import jax
import jax.numpy as jnp
from jax.experimental import pallas as pl
from jax.experimental.pallas import tpu as pltpu


# --------------------------------------------------------------------------- #
# Kernel bodies
# --------------------------------------------------------------------------- #
def _bn_epilogue(y, gamma, beta, eps, act):
    """Training-mode BatchNorm1d folded into a single scale/shift pass.

    One reduction pass builds sum(y) and sum(y*y) (XLU slot), then the
    normalization is applied as y*scale + shift.  All math in f32.
    """
    inv_n = 1.0 / float(y.shape[0])
    s1 = jnp.sum(y, axis=0, keepdims=True)              # (1, tn)
    s2 = jnp.sum(y * y, axis=0, keepdims=True)          # (1, tn)
    mean = s1 * inv_n
    # Biased variance via E[y^2] - mean^2; clamp guards the tiny negative
    # values rounding can produce for near-constant columns.
    var = jnp.maximum(s2 * inv_n - mean * mean, 0.0)
    inv = jax.lax.rsqrt(var + eps)
    scale = gamma * inv                                  # (1, tn)
    shift = beta - mean * scale                          # (1, tn)
    out = y * scale + shift
    if act is not None:
        out = act(out)
    return out


def _linear_bn_kernel_1k(x_ref, w_ref, gamma_ref, beta_ref, o_ref, *, eps, act):
    """Single-K-step variant: whole reduction axis resident, no accumulator."""
    j = pl.program_id(0)
    # Weight is in its native (C_out, C_in) layout; contract dim 1 of both
    # operands (x @ W^T) so no wrapper-side transpose is needed.
    y = jax.lax.dot_general(
        x_ref[...], w_ref[...],
        dimension_numbers=(((1,), (1,)), ((), ())),
        preferred_element_type=jnp.float32)
    gamma = gamma_ref[pl.ds(j, 1), :]                    # resident, sliced here
    beta = beta_ref[pl.ds(j, 1), :]
    o_ref[...] = _bn_epilogue(y, gamma, beta, eps, act).astype(o_ref.dtype)


def _linear_bn_kernel_acc(x_ref, w_ref, gamma_ref, beta_ref, o_ref, acc_ref,
                          *, eps, act):
    """Multi-K-step fallback: accumulate x @ W^T over K, BN epilogue on last K."""
    j = pl.program_id(0)
    k = pl.program_id(1)

    @pl.when(k == 0)
    def _():
        acc_ref[...] = jnp.zeros_like(acc_ref)

    acc_ref[...] += jax.lax.dot_general(
        x_ref[...], w_ref[...],
        dimension_numbers=(((1,), (1,)), ((), ())),
        preferred_element_type=jnp.float32)

    @pl.when(k == pl.num_programs(1) - 1)
    def _():
        gamma = gamma_ref[pl.ds(j, 1), :]
        beta = beta_ref[pl.ds(j, 1), :]
        o_ref[...] = _bn_epilogue(acc_ref[...], gamma, beta, eps,
                                  act).astype(o_ref.dtype)


# --------------------------------------------------------------------------- #
# Tile / hardware helpers
# --------------------------------------------------------------------------- #
def _tpu_info():
    """(vmem_bytes_per_core, num_tensorcores) — best effort, safe fallback."""
    try:
        vmem = int(pltpu.get_tpu_info().vmem_capacity_bytes)
        if vmem > 0:
            # Only v7x-class parts have <= 64 MiB VMEM per TC (and 2 TCs/chip).
            return vmem, (2 if vmem <= 64 * 1024 * 1024 else 1)
    except Exception:
        pass
    return 64 * 1024 * 1024, 1          # conservative memory, single-TC caps


def _largest_tile(dim, cap, units=(256, 128)):
    """Largest t <= cap that divides dim and is a multiple of a unit.

    Prefers multiples of 256 (full 256-wide MXU columns on v6e/v7x) unless a
    128-multiple is more than 2x larger.  Returns dim itself when dim <= cap
    or when dim cannot be tiled under the (8,128) rule (caller guards VMEM).
    """
    if dim <= cap:
        return dim
    best = 0
    for unit in units:
        t = (cap // unit) * unit
        while t >= unit and dim % t != 0:
            t -= unit
        if t >= unit and (best == 0 or t > 2 * best):
            best = t
    return best if best else dim


# --------------------------------------------------------------------------- #
# Public wrapper
# --------------------------------------------------------------------------- #
def linear_bn(x, weight, gamma, beta, *, eps=1e-5, act=None,
              tile_n=None, tile_k=None, compute_dtype=None, out_dtype=None,
              vmem_budget_bytes=None):
    """Fused Linear (no bias) + BatchNorm1d (training mode) + activation.

    x:      (N, C_in)      batch-major, feature-last (PyTorch layout)
    weight: (C_out, C_in)  PyTorch nn.Linear weight, native layout (no transpose)
    gamma/beta: (C_out,)   BatchNorm1d affine parameters
    """
    n, in_ch = x.shape
    out_ch, in_ch_w = weight.shape
    assert in_ch == in_ch_w

    if out_dtype is None:
        out_dtype = jnp.float32 if compute_dtype is not None else x.dtype

    if compute_dtype is not None:
        # NOTE: only worth it if the casted copies are reused across many
        # calls; the cast itself re-streams the f32 operands through HBM once.
        x = x.astype(compute_dtype)
        weight = weight.astype(compute_dtype)

    itemsize = jnp.dtype(x.dtype).itemsize
    out_itemsize = jnp.dtype(out_dtype).itemsize

    vmem_phys, num_tc = _tpu_info()
    if vmem_budget_bytes is None:
        # ~half of physical VMEM for our working set (64 MiB on v5e/v6e,
        # 32 MiB on v7x), leaving headroom for compiler scratch.
        vmem_budget_bytes = max(min(vmem_phys // 2, 96 << 20), 16 << 20)

    # --- resident-x / tile_k selection ---------------------------------------
    x_bytes_full = n * in_ch * itemsize
    # Single-buffer the resident x block (constant block index -> double
    # buffering buys nothing) only when it is big enough to matter.
    x_single_buffer = x_bytes_full >= (1 << 20)
    x_buf_factor = 1 if x_single_buffer else 2

    if tile_k is None:
        # Prefer the whole reduction axis resident (single K step; x DMA'd
        # exactly once for the entire call).
        k_cap = max(128, (vmem_budget_bytes // (2 * x_buf_factor))
                    // max(n * itemsize, 1))
        tile_k = _largest_tile(in_ch, k_cap)
    tile_k = min(tile_k, in_ch)
    assert in_ch % tile_k == 0, (in_ch, tile_k)
    n_k = in_ch // tile_k
    single_k = n_k == 1
    use_single_buffer_x = single_k and x_single_buffer

    # --- tile_n selection -----------------------------------------------------
    x_res = (x_buf_factor if single_k else 2) * n * tile_k * itemsize
    if tile_n is None:
        remaining = max(vmem_budget_bytes - x_res, vmem_budget_bytes // 4)
        # Per output column at one grid step: out tile (double-buffered) +
        # epilogue f32 temporaries (~2 arrays) + W tile (double-buffered)
        # [+ f32 accumulator on the multi-K path].
        per_col = n * (2 * out_itemsize + 2 * 4) + 2 * tile_k * itemsize
        if not single_k:
            per_col += n * 4
        n_cap = max(128, remaining // max(per_col, 1))
        if num_tc > 1 and out_ch >= 512 and out_ch % 256 == 0:
            # Multi-TensorCore (v7x): tile out_ch/2 so the number of output
            # tiles is even and the "parallel" axis splits evenly across TCs.
            tile_n = _largest_tile(out_ch // 2, min(n_cap, out_ch // 2))
        else:
            # Single-TC (v5e/v6e): biggest tile that fits.
            tile_n = _largest_tile(out_ch, n_cap)
    tile_n = min(tile_n, out_ch)
    assert out_ch % tile_n == 0, (out_ch, tile_n)
    n_j = out_ch // tile_n

    # --- VMEM accounting (incl. epilogue temporaries) + guard ----------------
    footprint = (x_res
                 + 2 * tile_k * tile_n * itemsize        # W blocks (x2 buffers)
                 + 2 * n * tile_n * out_itemsize         # out blocks (x2)
                 + 2 * n * tile_n * 4                    # epilogue f32 temps
                 + (0 if single_k else n * tile_n * 4)   # accumulator scratch
                 + 2 * 2 * out_ch * 4)                   # resident gamma/beta
    if footprint > (vmem_phys * 7) // 10:
        raise ValueError(
            f"linear_bn: selected tiles need ~{footprint} B VMEM "
            f"(physical {vmem_phys} B); shapes are not tileable under the "
            "(8,128) rule at this size — pass explicit tile_n/tile_k or pad "
            "in_ch/out_ch to multiples of 128.")
    vmem_limit = int(min(max(2 * footprint, 32 << 20), (vmem_phys * 3) // 4))

    # --- operand prep (tiny, glue only) ---------------------------------------
    # gamma/beta become (n_j, tile_n): fully VMEM-resident with a constant
    # block index; the kernel slices row j — no per-grid-step DMAs.
    gamma_r = gamma.astype(jnp.float32).reshape(n_j, tile_n)
    beta_r = beta.astype(jnp.float32).reshape(n_j, tile_n)

    # --- build the call --------------------------------------------------------
    if single_k:
        x_spec_kwargs = {}
        if use_single_buffer_x:
            x_spec_kwargs["pipeline_mode"] = pl.Buffered(1)
        kernel = functools.partial(_linear_bn_kernel_1k, eps=eps, act=act)
        grid = (n_j,)
        in_specs = [
            pl.BlockSpec((n, in_ch), lambda j: (0, 0), **x_spec_kwargs),  # x, resident
            pl.BlockSpec((tile_n, in_ch), lambda j: (j, 0)),              # W (native)
            pl.BlockSpec((n_j, tile_n), lambda j: (0, 0)),                # gamma
            pl.BlockSpec((n_j, tile_n), lambda j: (0, 0)),                # beta
        ]
        out_specs = pl.BlockSpec((n, tile_n), lambda j: (0, j))
        scratch = []
        dims = ("parallel",)
    else:
        # TODO(synk): this path re-streams x once per output tile; a two-pass
        #             sum/sumsq-over-batch restructure would remove that.
        kernel = functools.partial(_linear_bn_kernel_acc, eps=eps, act=act)
        grid = (n_j, n_k)                                        # reduction last
        in_specs = [
            pl.BlockSpec((n, tile_k), lambda j, k: (0, k)),              # x
            pl.BlockSpec((tile_n, tile_k), lambda j, k: (j, k)),         # W (native)
            pl.BlockSpec((n_j, tile_n), lambda j, k: (0, 0)),            # gamma
            pl.BlockSpec((n_j, tile_n), lambda j, k: (0, 0)),            # beta
        ]
        out_specs = pl.BlockSpec((n, tile_n), lambda j, k: (0, j))
        scratch = [pltpu.VMEM((n, tile_n), jnp.float32)]
        dims = ("parallel", "arbitrary")

    return pl.pallas_call(
        kernel,
        out_shape=jax.ShapeDtypeStruct((n, out_ch), out_dtype),
        grid_spec=pltpu.PrefetchScalarGridSpec(
            num_scalar_prefetch=0,
            grid=grid,
            in_specs=in_specs,
            out_specs=out_specs,
            scratch_shapes=scratch),
        compiler_params=pltpu.CompilerParams(
            dimension_semantics=dims,
            vmem_limit_bytes=vmem_limit),
    )(x, weight, gamma_r, beta_r)


# --------------------------------------------------------------------------- #
# Self-test
# --------------------------------------------------------------------------- #
if __name__ == "__main__":
    key = jax.random.PRNGKey(0)
    kx, kw, kg, kb, kx2, kw2, kg2, kb2 = jax.random.split(key, 8)

    def ref_linear_bn(x, weight, gamma, beta, eps, act):
        y = x @ weight.T
        mean = y.mean(axis=0)
        var = ((y - mean) ** 2).mean(axis=0)          # biased (training mode)
        out = (y - mean) / jnp.sqrt(var + eps) * gamma + beta
        return act(out) if act is not None else out

    # --- case 1: small shapes, single-K resident-x fast path, ReLU ------------
    N, IN_CH, OUT_CH = 8, 256, 128
    x = jax.random.normal(kx, (N, IN_CH), jnp.float32)
    bound = 1.0 / (IN_CH ** 0.5)                      # nn.Linear default init
    weight = jax.random.uniform(kw, (OUT_CH, IN_CH), jnp.float32, -bound, bound)
    gamma = jax.random.uniform(kg, (OUT_CH,), jnp.float32, 0.5, 1.5)
    beta = jax.random.uniform(kb, (OUT_CH,), jnp.float32, -0.5, 0.5)

    out = jax.block_until_ready(
        linear_bn(x, weight, gamma, beta, eps=1e-5, act=jax.nn.relu))
    ref = ref_linear_bn(x, weight, gamma, beta, 1e-5, jax.nn.relu)
    assert out.shape == (N, OUT_CH) and out.dtype == jnp.float32
    assert jnp.allclose(out, ref, atol=1e-4, rtol=1e-4), float(
        jnp.max(jnp.abs(out - ref)))

    # --- case 2: forced tiling exercises the multi-K accumulator path ---------
    N2, IN2, OUT2 = 16, 512, 1024
    x2 = jax.random.normal(kx2, (N2, IN2), jnp.float32)
    bound2 = 1.0 / (IN2 ** 0.5)
    weight2 = jax.random.uniform(kw2, (OUT2, IN2), jnp.float32, -bound2, bound2)
    gamma2 = jax.random.uniform(kg2, (OUT2,), jnp.float32, 0.5, 1.5)
    beta2 = jax.random.uniform(kb2, (OUT2,), jnp.float32, -0.5, 0.5)

    out2 = jax.block_until_ready(
        linear_bn(x2, weight2, gamma2, beta2, eps=1e-5, act=None,
                  tile_n=256, tile_k=256))
    ref2 = ref_linear_bn(x2, weight2, gamma2, beta2, 1e-5, None)
    assert out2.shape == (N2, OUT2) and out2.dtype == jnp.float32
    assert jnp.allclose(out2, ref2, atol=1e-4, rtol=1e-4), float(
        jnp.max(jnp.abs(out2 - ref2)))

    print("KERNEL_OK")
</pallas_src>

<mosaic_0001>
module attributes {stable_mosaic.version = 11 : i64} {
  func.func @_linear_bn_kernel_1k(%arg0: i32, %arg1: memref<8x256xf32, #tpu.memory_space<vmem>>, %arg2: memref<128x256xf32, #tpu.memory_space<vmem>>, %arg3: memref<1x128xf32, #tpu.memory_space<vmem>>, %arg4: memref<1x128xf32, #tpu.memory_space<vmem>>, %arg5: memref<8x128xf32, #tpu.memory_space<vmem>>) attributes {dimension_semantics = [#tpu.dimension_semantics<parallel>], iteration_bounds = array<i64: 1>, scalar_prefetch = 0 : i64, scratch_operands = 0 : i64, tpu.core_type = #tpu.core_type<tc>, window_params = [{pipeline_mode = #tpu.pipeline_mode<synchronous>, transform_indices = @transform_0, window_bounds = array<i64: 8, 256>}, {transform_indices = @transform_1, window_bounds = array<i64: 128, 256>}, {pipeline_mode = #tpu.pipeline_mode<synchronous>, transform_indices = @transform_2, window_bounds = array<i64: 1, 128>}, {pipeline_mode = #tpu.pipeline_mode<synchronous>, transform_indices = @transform_3, window_bounds = array<i64: 1, 128>}, {transform_indices = @transform_4, window_bounds = array<i64: 8, 128>}]} {
    %c0 = arith.constant 0 : index
    %c0_0 = arith.constant 0 : index
    %0 = vector.load %arg1[%c0, %c0_0] : memref<8x256xf32, #tpu.memory_space<vmem>>, vector<8x256xf32>
    %c0_1 = arith.constant 0 : index
    %c0_2 = arith.constant 0 : index
    %1 = vector.load %arg2[%c0_1, %c0_2] : memref<128x256xf32, #tpu.memory_space<vmem>>, vector<128x256xf32>
    %cst = arith.constant dense<0.000000e+00> : vector<8x128xf32>
    %2 = tpu.matmul %0, %1, %cst {dimension_numbers = #tpu.dot_dimension_numbers<[1], [1], [0], [0], [0, 0, 1, 0], [], []>} : vector<8x256xf32>, vector<128x256xf32>, vector<8x128xf32> -> vector<8x128xf32>
    %3 = arith.index_cast %arg0 : i32 to index
    %c0_3 = arith.constant 0 : index
    %4 = vector.load %arg3[%3, %c0_3] : memref<1x128xf32, #tpu.memory_space<vmem>>, vector<1x128xf32>
    %5 = arith.index_cast %arg0 : i32 to index
    %c0_4 = arith.constant 0 : index
    %6 = vector.load %arg4[%5, %c0_4] : memref<1x128xf32, #tpu.memory_space<vmem>>, vector<1x128xf32>
    %cst_5 = arith.constant dense<0.000000e+00> : vector<128xf32>
    %7 = vector.multi_reduction <add>, %2, %cst_5 [0] : vector<8x128xf32> to vector<128xf32>
    %8 = vector.shape_cast %7 : vector<128xf32> to vector<1x128xf32>
    %9 = arith.mulf %2, %2 : vector<8x128xf32>
    %cst_6 = arith.constant dense<0.000000e+00> : vector<128xf32>
    %10 = vector.multi_reduction <add>, %9, %cst_6 [0] : vector<8x128xf32> to vector<128xf32>
    %11 = vector.shape_cast %10 : vector<128xf32> to vector<1x128xf32>
    %cst_7 = arith.constant 1.250000e-01 : f32
    %12 = vector.broadcast %cst_7 : f32 to vector<1x128xf32>
    %13 = arith.mulf %8, %12 : vector<1x128xf32>
    %cst_8 = arith.constant 1.250000e-01 : f32
    %14 = vector.broadcast %cst_8 : f32 to vector<1x128xf32>
    %15 = arith.mulf %11, %14 : vector<1x128xf32>
    %16 = arith.mulf %13, %13 : vector<1x128xf32>
    %17 = arith.subf %15, %16 : vector<1x128xf32>
    %cst_9 = arith.constant 0.000000e+00 : f32
    %18 = vector.broadcast %cst_9 : f32 to vector<1x128xf32>
    %19 = arith.maximumf %17, %18 : vector<1x128xf32>
    %cst_10 = arith.constant 9.99999974E-6 : f32
    %20 = vector.broadcast %cst_10 : f32 to vector<1x128xf32>
    %21 = arith.addf %19, %20 : vector<1x128xf32>
    %22 = math.rsqrt %21 : vector<1x128xf32>
    %23 = arith.mulf %4, %22 : vector<1x128xf32>
    %24 = arith.mulf %13, %23 : vector<1x128xf32>
    %25 = arith.subf %6, %24 : vector<1x128xf32>
    %26 = vector.broadcast %23 : vector<1x128xf32> to vector<8x128xf32>
    %27 = arith.mulf %2, %26 : vector<8x128xf32>
    %28 = vector.broadcast %25 : vector<1x128xf32> to vector<8x128xf32>
    %29 = arith.addf %27, %28 : vector<8x128xf32>
    %cst_11 = arith.constant 0.000000e+00 : f32
    %30 = vector.broadcast %cst_11 : f32 to vector<8x128xf32>
    %31 = arith.maximumf %29, %30 : vector<8x128xf32>
    %c0_12 = arith.constant 0 : index
    %c0_13 = arith.constant 0 : index
    %32 = vector.load %arg5[%c0_12, %c0_13] : memref<8x128xf32, #tpu.memory_space<vmem>>, vector<8x128xf32>
    tpu.vector_store %arg5[%c0_12, %c0_13], %31 {strides = array<i32>} : memref<8x128xf32, #tpu.memory_space<vmem>>, vector<8x128xf32>,
    return
  }
  func.func @transform_0(%arg0: i32) -> (i32, i32) {
    %c0_i32 = arith.constant 0 : i32
    %c0_i32_0 = arith.constant 0 : i32
    %c0_i32_1 = arith.constant 0 : i32
    return %c0_i32, %c0_i32_0 : i32, i32
  }
  func.func @transform_1(%arg0: i32) -> (i32, i32) {
    %c0_i32 = arith.constant 0 : i32
    %c0_i32_0 = arith.constant 0 : i32
    return %arg0, %c0_i32 : i32, i32
  }
  func.func @transform_2(%arg0: i32) -> (i32, i32) {
    %c0_i32 = arith.constant 0 : i32
    %c0_i32_0 = arith.constant 0 : i32
    %c0_i32_1 = arith.constant 0 : i32
    return %c0_i32, %c0_i32_0 : i32, i32
  }
  func.func @transform_3(%arg0: i32) -> (i32, i32) {
    %c0_i32 = arith.constant 0 : i32
    %c0_i32_0 = arith.constant 0 : i32
    %c0_i32_1 = arith.constant 0 : i32
    return %c0_i32, %c0_i32_0 : i32, i32
  }
  func.func @transform_4(%arg0: i32) -> (i32, i32) {
    %c0_i32 = arith.constant 0 : i32
    %c0_i32_0 = arith.constant 0 : i32
    return %c0_i32, %arg0 : i32, i32
  }
}

</mosaic_0001>

<bundles_post_ra>
// kernel: tpu_custom_call.1
= control target key start
LH: loop header
LB: loop body
LE: loop exit
PB: predicated region body
PF: predicated region fallthrough
CT: control target
= control target key end

     0   :  { %9 = vsyncpa [#allocation3], 0  ;;  %s314_s0 = inlined_call_operand.hbm [shape: f32[8,256], index: 0, kind: input, shape index: {}]   ;;  %s315_s1 = inlined_call_operand.hbm [shape: f32[128,256], index: 1, kind: input, shape index: {}]   ;;  %s316_s2 = inlined_call_operand.vmem [shape: f32[1,128], index: 2, kind: input, shape index: {}]   ;;  %s317_s3 = inlined_call_operand.vmem [shape: f32[1,128], index: 3, kind: input, shape index: {}]   ;;  %s318_s4 = inlined_call_operand.hbm [shape: f32[8,128], index: 4, kind: output, shape index: {}]  }
   0x1   :  { %10 = vsyncpa [#allocation6], 0 }
   0x2   :  { %11 = vsyncpa [#allocation4], 0  ;;  %s17_s17 = sshll.u32 %s314_s0, 4  ;;  %s269_s18 = smov [#allocation2]   ;;  %s18_s17 = int_to_ptr.hbm [resolvable:$true] %s17_s17 }
   0x3   :  { %s19_s19 = sshll.u32 %s269_s18, 4  ;;  %s27_s22 = sshll.u32 %s315_s1, 4  ;;  %s20_s19 = int_to_ptr.vmem [resolvable:$true] %s19_s19  ;;  %s28_s22 = int_to_ptr.hbm [resolvable:$true] %s27_s22 }
   0x4   :  { %22 = dma.hbm_to_vmem [thread:$0]  %s18_s17, 256, %s20_s19, [#allocation3]  }
   0x5   :  { %s270_s23 = smov [#allocation5]   ;;  %s271_s25 = smov 256  }
   0x6   :  { %s29_s24 = sshll.u32 %s270_s23, 4  ;;  %s272_s26 = smov 16   ;;  %s30_s24 = int_to_ptr.vmem [resolvable:$true] %s29_s24 }
   0x7   :  { %35 = dma.hbm_to_vmem [thread:$0]  %s28_s22, 4096, %s30_s24, [#allocation6], %s271_s25, %s271_s25, %s272_s26  }
   0x8   :  { %263 = dma.done.wait [#allocation3], 256  }
   0x9   :  { %264 = vsyncadd [#allocation3], 4294967040 }
   0xa   :  { %265 = dma.done.wait [#allocation6], 4096  }
   0xb   :  { %266 = vsyncadd [#allocation6], 4294963200  ;;  %v80_v0 = vld [vmem:[#allocation5 + $0xf0] sm:$0xff]  ;;  %v81_v1 = vld [vmem:[#allocation5 + $0xf8] sm:$0xff]  ;;  %s273_s29 = smov [#allocation7]  }
   0xc   :  { %82 = vmatpush.xpose.msra.mxu0 %v80_v0  ;;  %102 = vmatpush.xpose.msra.mxu1 %v81_v1  ;;  %v78_v2 = vld [vmem:[#allocation5 + $0xe0] sm:$0xff]  ;;  %v79_v3 = vld [vmem:[#allocation5 + $0xe8] sm:$0xff]  ;;  %v76_v4 = vld [vmem:[#allocation5 + $0xd0] sm:$0xff]  ;;  %s171_s30 = sshll.u32 %s273_s29, 4  ;;  %s172_s30 = int_to_ptr.vmem [resolvable:$true] %s171_s30 }
   0xd   :  { %v77_v5 = vld [vmem:[#allocation5 + $0xd8] sm:$0xff]  ;;  %v74_v6 = vld [vmem:[#allocation5 + $0xc0] sm:$0xff]  ;;  %v75_v7 = vld [vmem:[#allocation5 + $0xc8] sm:$0xff] }
   0xe   :  { %v72_v8 = vld [vmem:[#allocation5 + $0xb0] sm:$0xff]  ;;  %v73_v9 = vld [vmem:[#allocation5 + $0xb8] sm:$0xff]  ;;  %v70_v10 = vld [vmem:[#allocation5 + $0xa0] sm:$0xff] }
   0xf   :  { %v71_v11 = vld [vmem:[#allocation5 + $0xa8] sm:$0xff]  ;;  %v68_v12 = vld [vmem:[#allocation5 + $0x90] sm:$0xff]  ;;  %v69_v13 = vld [vmem:[#allocation5 + $0x98] sm:$0xff] }
  0x10   :  { %83 = vmatpush.xpose.msra.mxu0 %v78_v2  ;;  %103 = vmatpush.xpose.msra.mxu1 %v79_v3  ;;  %v66_v14 = vld [vmem:[#allocation5 + $0x80] sm:$0xff]  ;;  %v67_v15 = vld [vmem:[#allocation5 + $0x88] sm:$0xff]  ;;  %v64_v16 = vld [vmem:[#allocation5 + $0x70] sm:$0xff] }
  0x11   :  { %v65_v17 = vld [vmem:[#allocation5 + $0x78] sm:$0xff]  ;;  %v62_v18 = vld [vmem:[#allocation5 + $0x60] sm:$0xff]  ;;  %v63_v19 = vld [vmem:[#allocation5 + $0x68] sm:$0xff] }
  0x12   :  { %v60_v20 = vld [vmem:[#allocation5 + $0x50] sm:$0xff]  ;;  %v61_v21 = vld [vmem:[#allocation5 + $0x58] sm:$0xff]  ;;  %v58_v22 = vld [vmem:[#allocation5 + $0x40] sm:$0xff] }
  0x13   :  { %v59_v23 = vld [vmem:[#allocation5 + $0x48] sm:$0xff]  ;;  %v56_v24 = vld [vmem:[#allocation5 + $0x30] sm:$0xff]  ;;  %v57_v25 = vld [vmem:[#allocation5 + $0x38] sm:$0xff] }
  0x14   :  { %84 = vmatpush.xpose.msra.mxu0 %v76_v4  ;;  %104 = vmatpush.xpose.msra.mxu1 %v77_v5  ;;  %v54_v26 = vld [vmem:[#allocation5 + $0x20] sm:$0xff]  ;;  %v55_v27 = vld [vmem:[#allocation5 + $0x28] sm:$0xff]  ;;  %v52_v28 = vld [vmem:[#allocation5 + $0x10] sm:$0xff] }
  0x15   :  { %v53_v29 = vld [vmem:[#allocation5 + $0x18] sm:$0xff]  ;;  %v50_v30 = vld [vmem:[#allocation5] sm:$0xff]  ;;  %v51_v31 = vld [vmem:[#allocation5 + $0x8] sm:$0xff] }
  0x16   :  { %v48_v32 = vld [vmem:[#allocation2] sm:$0xff]  ;;  %v49_v33 = vld [vmem:[#allocation2 + $0x8] sm:$0xff] }
  0x17   :  { %v122_v61 = vld [vmem:[%s316_s2] sm:$0x1]  ;;  %s173_s2 = sshll.u32 %s318_s4, 4  ;;  %s174_s2 = int_to_ptr.hbm [resolvable:$true] %s173_s2 }
  0x18   :  { %85 = vmatpush.xpose.msra.mxu0 %v74_v6  ;;  %105 = vmatpush.xpose.msra.mxu1 %v75_v7  ;;  %v123_v1 = vld [vmem:[%s317_s3] sm:$0x1] }
  0x1c   :  { %86 = vmatpush.xpose.msra.mxu0 %v72_v8  ;;  %106 = vmatpush.xpose.msra.mxu1 %v73_v9 }
  0x20   :  { %87 = vmatpush.xpose.msra.mxu0 %v70_v10  ;;  %107 = vmatpush.xpose.msra.mxu1 %v71_v11 }
  0x24   :  { %88 = vmatpush.xpose.msra.mxu0 %v68_v12  ;;  %108 = vmatpush.xpose.msra.mxu1 %v69_v13 }
  0x28   :  { %89 = vmatpush.xpose.msra.mxu0 %v66_v14  ;;  %109 = vmatpush.xpose.msra.mxu1 %v67_v15 }
  0x2c   :  { %90 = vmatpush.xpose.msra.mxu0 %v64_v16  ;;  %110 = vmatpush.xpose.msra.mxu1 %v65_v17 }
  0x30   :  { %91 = vmatpush.xpose.msra.mxu0 %v62_v18  ;;  %111 = vmatpush.xpose.msra.mxu1 %v63_v19 }
  0x34   :  { %92 = vmatpush.xpose.msra.mxu0 %v60_v20  ;;  %112 = vmatpush.xpose.msra.mxu1 %v61_v21 }
  0x38   :  { %93 = vmatpush.xpose.msra.mxu0 %v58_v22  ;;  %113 = vmatpush.xpose.msra.mxu1 %v59_v23 }
  0x3c   :  { %94 = vmatpush.xpose.msra.mxu0 %v56_v24  ;;  %114 = vmatpush.xpose.msra.mxu1 %v57_v25 }
  0x40   :  { %95 = vmatpush.xpose.msra.mxu0 %v54_v26  ;;  %115 = vmatpush.xpose.msra.mxu1 %v55_v27 }
  0x44   :  { %96 = vmatpush.xpose.msra.mxu0 %v52_v28  ;;  %116 = vmatpush.xpose.msra.mxu1 %v53_v29 }
  0x48   :  { %97 = vmatpush.xpose.msra.mxu0 %v50_v30  ;;  %117 = vmatpush.xpose.msra.mxu1 %v51_v31 }
  0x4b   :  { %98 = vmatmul.f32.vlgmr.msra.gmra.mxu0 %v48_v32  ;;  %118 = vmatmul.f32.vlgmr.msra.gmra.mxu1 %v49_v33 }
  0xc8   :  { %v99_v34 = vpop.f32.mrf.mxu0  ;;  %v119_v35 = vpop.f32.mrf.mxu1 }
  0xc9   :  { %v120_v36 = vadd.f32 %v119_v35, %v99_v34 }
  0xcb   :  { %v124_v37 = vrot.slane %v120_v36, 4  ;;  %v130_v38 = vmul.f32 %v120_v36, %v120_v36 }
  0xcd   :  { %v125_v39 = vadd.f32 %v124_v37, %v120_v36  ;;  %v131_v40 = vrot.slane %v130_v38, 4 }
  0xcf   :  { %v126_v41 = vrot.slane %v125_v39, 2  ;;  %v132_v42 = vadd.f32 %v131_v40, %v130_v38 }
  0xd1   :  { %v127_v43 = vadd.f32 %v126_v41, %v125_v39  ;;  %v133_v44 = vrot.slane %v132_v42, 2 }
  0xd3   :  { %v128_v45 = vrot.slane %v127_v43, 1  ;;  %v134_v46 = vadd.f32 %v133_v44, %v132_v42 }
  0xd5   :  { %v129_v47 = vadd.f32 %v128_v45, %v127_v43  ;;  %v135_v48 = vrot.slane %v134_v46, 1 }
  0xd7   :  { %v136_v49 = vadd.f32 %v135_v48, %v134_v46  ;;  %v137_v50 = vmul.f32 0.125, %v129_v47 }
  0xd9   :  { %v138_v51 = vmul.f32 0.125, %v136_v49  ;;  %v139_v52 = vmul.f32 %v137_v50, %v137_v50 }
  0xdb   :  { %v140_v53 = vsub.f32 %v138_v51, %v139_v52 }
  0xdd   :  { %v141_v54 = vmax.f32 %v140_v53, 0.0 }
  0xdf   :  { %v142_v55 = vadd.f32 1e-05, %v141_v54 }
  0xe1   :  { %189 = vrsqrt.f32 %v142_v55  ;;  %vm149_vm1 = vweird.f32 %v142_v55 }
  0xe7   :  { %v190_v56 = vpop.eup %189 }
  0xe8   :  { %v144_v57 = vmul.f32 %v190_v56, %v142_v55  ;;  %vm150_vm0 = vweird.f32 %v190_v56 }
  0xe9   :  { %vm151_vm2 = vmor %vm149_vm1, %vm150_vm0 }
  0xea   :  { %v145_v58 = vmul.f32 %v190_v56, %v144_v57 }
  0xec   :  { %v146_v59 = vmul.f32 0.5, %v145_v58 }
  0xee   :  { %v147_v60 = vsub.f32 1.5, %v146_v59 }
  0xf0   :  { %v148_v62 = vmul.f32 %v190_v56, %v147_v60 }
  0xf2   :  { %v152_v63 = vsel %vm151_vm2, %v190_v56, %v148_v62 }
  0xf3   :  { %v153_v0 = vmul.f32 %v152_v63, %v122_v61 }
  0xf5   :  { %v154_v2 = vmul.f32 %v153_v0, %v137_v50  ;;  %v157_v3 = vperm.slane %v153_v0, 0 }
  0xf7   :  { %v155_v4 = vsub.f32 %v123_v1, %v154_v2  ;;  %v159_v5 = vmul.f32 %v157_v3, %v120_v36 }
  0xf9   :  { %v161_v6 = vperm.slane %v155_v4, 0 }
  0xfb   :  { %v163_v7 = vadd.f32 %v161_v6, %v159_v5 }
  0xfd   :  { %v164_v8 = vmax.f32 %v163_v7, 0.0 }
  0xff   :  { %165 = vst [vmem:[#allocation7] sm:$0xff] %v164_v8 }
 0x100   :  { %176 = dma.vmem_to_hbm [thread:$0]  %s172_s30, 128, %s174_s2, [#allocation4]  }
 0x101   :  { %267 = dma.done.wait [#allocation4], 128  }
 0x102   :  { %268 = vsyncadd [#allocation4], 4294967168 }
 0x103   :  { %181 = vsyncpa [#allocation3], 1 }
 0x104   :  { %182 = vsyncpa [#allocation6], 1 }
 0x105   :  { %183 = vsyncpa [#allocation4], 1 }

</bundles_post_ra>
